<compile_context>
chip_gen: v5e
topology: v5e:2x2
jax: 0.10.0
libtpu: 0.0.40
codegen_flags: <defaults>
</compile_context>

<pallas_src>
import functools

import jax
import jax.numpy as jnp
from jax.experimental import pallas as pl
from jax.experimental.pallas import tpu as pltpu

N_CLASSES = 6
LANES = 128
MAX_ROWS_PER_TILE = 512  # (512, 128) f32 tile = 256 KiB per input


def _qwk_kernel(logits_ref, labels_ref, out_ref,
                s_num, s_p, s_l, s_p2, s_l2, *, inv_n, max_class):
    # logits_ref, labels_ref: (rows_per_tile, 128) f32 tiles in VMEM
    # out_ref: (1, 1) f32
    # s_*: (1, 1) f32 scalar accumulators (persist across grid steps)
    step = pl.program_id(0)

    @pl.when(step == 0)
    def _init():
        for acc in (s_num, s_p, s_l, s_p2, s_l2):
            acc[...] = jnp.zeros_like(acc)

    # round + clamp to [0, n_classes-1]  (matches torch.round -> clamp -> long)
    p = jnp.clip(jnp.round(logits_ref[...]), 0.0, max_class)
    l = jnp.clip(jnp.round(labels_ref[...]), 0.0, max_class)
    d = p - l

    # Five streaming reductions (zero-padded tail contributes exactly 0).
    s_num[...] += jnp.sum(d * d, keepdims=True)
    s_p[...]   += jnp.sum(p, keepdims=True)
    s_l[...]   += jnp.sum(l, keepdims=True)
    s_p2[...]  += jnp.sum(p * p, keepdims=True)
    s_l2[...]  += jnp.sum(l * l, keepdims=True)

    @pl.when(step == pl.num_programs(0) - 1)
    def _finalize():
        num = s_num[...]
        # sum(W*E) with total == N (clipping guarantees every sample counts once)
        den = s_p2[...] + s_l2[...] - 2.0 * s_p[...] * s_l[...] * inv_n + 1e-10
        out_ref[...] = (1.0 - num / den).astype(jnp.float32)


def qwk_loss(logits, labels, n_classes=N_CLASSES):
    """Pallas QWK loss. logits, labels: (N,) float arrays. Returns f32 scalar."""
    assert logits.shape == labels.shape and logits.ndim == 1
    n = logits.shape[0]

    # Lane-dense layout: pad N up to a multiple of 128 (and of the tile) and
    # reshape to (rows, 128).
    n_rows = -(-n // LANES)
    if n_rows <= MAX_ROWS_PER_TILE:
        rows_per_tile = n_rows          # single tile == full array (8,128-rule ok)
        padded_rows = n_rows
    else:
        rows_per_tile = MAX_ROWS_PER_TILE
        padded_rows = -(-n_rows // MAX_ROWS_PER_TILE) * MAX_ROWS_PER_TILE
    padded_n = padded_rows * LANES
    grid = (padded_rows // rows_per_tile,)

    def prep(x):
        x = x.astype(jnp.float32).reshape(-1)
        x = jnp.pad(x, (0, padded_n - n))  # zeros -> contribute 0 to all sums
        return x.reshape(padded_rows, LANES)

    logits2d = prep(logits)
    labels2d = prep(labels)

    kernel = functools.partial(
        _qwk_kernel, inv_n=1.0 / float(n), max_class=float(n_classes - 1))

    out = pl.pallas_call(
        kernel,
        out_shape=jax.ShapeDtypeStruct((1, 1), jnp.float32),
        grid_spec=pltpu.PrefetchScalarGridSpec(
            num_scalar_prefetch=0,
            grid=grid,
            in_specs=[
                pl.BlockSpec((rows_per_tile, LANES), lambda i: (i, 0)),
                pl.BlockSpec((rows_per_tile, LANES), lambda i: (i, 0)),
            ],
            out_specs=pl.BlockSpec((1, 1), lambda i: (0, 0)),
            scratch_shapes=[pltpu.VMEM((1, 1), jnp.float32) for _ in range(5)],
        ),
        compiler_params=pltpu.CompilerParams(
            dimension_semantics=("arbitrary",)),
    )(logits2d, labels2d)
    return out[0, 0]


def qwk_loss_ref(logits, labels, n_classes=N_CLASSES):
    """Pure-JAX reference mirroring the PyTorch forward (one-hot formulation)."""
    p = jnp.clip(jnp.round(logits), 0, n_classes - 1).astype(jnp.int32)
    l = jnp.clip(jnp.round(labels), 0, n_classes - 1).astype(jnp.int32)
    p_oh = jax.nn.one_hot(p, n_classes, dtype=jnp.float32)
    l_oh = jax.nn.one_hot(l, n_classes, dtype=jnp.float32)
    O = l_oh.T @ p_oh
    total = O.sum()
    E = jnp.outer(l_oh.sum(0), p_oh.sum(0)) / total
    i = jnp.arange(n_classes, dtype=jnp.float32)
    W = (i[:, None] - i[None, :]) ** 2
    num = jnp.sum(W * O)
    den = jnp.sum(W * E) + 1e-10
    return 1.0 - num / den


if __name__ == "__main__":
    key = jax.random.PRNGKey(0)

    # Case 1: N = 128 (exactly one lane-row)
    k1, k2, k3, k4 = jax.random.split(key, 4)
    N1 = 128
    logits1 = jax.random.uniform(k1, (N1,), minval=-1.0, maxval=7.0, dtype=jnp.float32)
    labels1 = jax.random.randint(k2, (N1,), 0, N_CLASSES).astype(jnp.float32)
    out1 = qwk_loss(logits1, labels1)
    jax.block_until_ready(out1)
    ref1 = qwk_loss_ref(logits1, labels1)
    assert jnp.allclose(out1, ref1, atol=1e-5, rtol=1e-5), (out1, ref1)

    # Case 2: N = 200 (exercises the zero-padding path)
    N2 = 200
    logits2 = jax.random.uniform(k3, (N2,), minval=-1.0, maxval=7.0, dtype=jnp.float32)
    labels2 = jax.random.randint(k4, (N2,), 0, N_CLASSES).astype(jnp.float32)
    out2 = qwk_loss(logits2, labels2)
    jax.block_until_ready(out2)
    ref2 = qwk_loss_ref(logits2, labels2)
    assert jnp.allclose(out2, ref2, atol=1e-5, rtol=1e-5), (out2, ref2)

    print("KERNEL_OK")
</pallas_src>

<mosaic_0001>
module attributes {stable_mosaic.version = 11 : i64} {
  func.func @_qwk_kernel(%arg0: i32, %arg1: memref<1x128xf32, #tpu.memory_space<vmem>>, %arg2: memref<1x128xf32, #tpu.memory_space<vmem>>, %arg3: memref<1x1xf32, #tpu.memory_space<vmem>>, %arg4: memref<1x1xf32, #tpu.memory_space<vmem>>, %arg5: memref<1x1xf32, #tpu.memory_space<vmem>>, %arg6: memref<1x1xf32, #tpu.memory_space<vmem>>, %arg7: memref<1x1xf32, #tpu.memory_space<vmem>>, %arg8: memref<1x1xf32, #tpu.memory_space<vmem>>) attributes {dimension_semantics = [#tpu.dimension_semantics<arbitrary>], iteration_bounds = array<i64: 1>, scalar_prefetch = 0 : i64, scratch_operands = 5 : i64, tpu.core_type = #tpu.core_type<tc>, window_params = [{transform_indices = @transform_0, window_bounds = array<i64: 1, 128>}, {transform_indices = @transform_1, window_bounds = array<i64: 1, 128>}, {pipeline_mode = #tpu.pipeline_mode<synchronous>, transform_indices = @transform_2, window_bounds = array<i64: 1, 1>}]} {
    %c0_i32 = arith.constant 0 : i32
    %0 = arith.cmpi eq, %arg0, %c0_i32 : i32
    %1 = arith.extui %0 : i1 to i32
    %c0_i32_0 = arith.constant 0 : i32
    %2 = arith.cmpi ne, %1, %c0_i32_0 : i32
    scf.if %2 {
      %cst_34 = arith.constant 0.000000e+00 : f32
      %62 = vector.broadcast %cst_34 : f32 to vector<1x1xf32>
      %c0_35 = arith.constant 0 : index
      %c0_36 = arith.constant 0 : index
      %63 = vector.load %arg4[%c0_35, %c0_36] : memref<1x1xf32, #tpu.memory_space<vmem>>, vector<1x1xf32>
      tpu.vector_store %arg4[%c0_35, %c0_36], %62 {strides = array<i32>} : memref<1x1xf32, #tpu.memory_space<vmem>>, vector<1x1xf32>,
      %cst_37 = arith.constant 0.000000e+00 : f32
      %64 = vector.broadcast %cst_37 : f32 to vector<1x1xf32>
      %c0_38 = arith.constant 0 : index
      %c0_39 = arith.constant 0 : index
      %65 = vector.load %arg5[%c0_38, %c0_39] : memref<1x1xf32, #tpu.memory_space<vmem>>, vector<1x1xf32>
      tpu.vector_store %arg5[%c0_38, %c0_39], %64 {strides = array<i32>} : memref<1x1xf32, #tpu.memory_space<vmem>>, vector<1x1xf32>,
      %cst_40 = arith.constant 0.000000e+00 : f32
      %66 = vector.broadcast %cst_40 : f32 to vector<1x1xf32>
      %c0_41 = arith.constant 0 : index
      %c0_42 = arith.constant 0 : index
      %67 = vector.load %arg6[%c0_41, %c0_42] : memref<1x1xf32, #tpu.memory_space<vmem>>, vector<1x1xf32>
      tpu.vector_store %arg6[%c0_41, %c0_42], %66 {strides = array<i32>} : memref<1x1xf32, #tpu.memory_space<vmem>>, vector<1x1xf32>,
      %cst_43 = arith.constant 0.000000e+00 : f32
      %68 = vector.broadcast %cst_43 : f32 to vector<1x1xf32>
      %c0_44 = arith.constant 0 : index
      %c0_45 = arith.constant 0 : index
      %69 = vector.load %arg7[%c0_44, %c0_45] : memref<1x1xf32, #tpu.memory_space<vmem>>, vector<1x1xf32>
      tpu.vector_store %arg7[%c0_44, %c0_45], %68 {strides = array<i32>} : memref<1x1xf32, #tpu.memory_space<vmem>>, vector<1x1xf32>,
      %cst_46 = arith.constant 0.000000e+00 : f32
      %70 = vector.broadcast %cst_46 : f32 to vector<1x1xf32>
      %c0_47 = arith.constant 0 : index
      %c0_48 = arith.constant 0 : index
      %71 = vector.load %arg8[%c0_47, %c0_48] : memref<1x1xf32, #tpu.memory_space<vmem>>, vector<1x1xf32>
      tpu.vector_store %arg8[%c0_47, %c0_48], %70 {strides = array<i32>} : memref<1x1xf32, #tpu.memory_space<vmem>>, vector<1x1xf32>,
    } else {
    }
    %c0 = arith.constant 0 : index
    %c0_1 = arith.constant 0 : index
    %3 = vector.load %arg1[%c0, %c0_1] : memref<1x128xf32, #tpu.memory_space<vmem>>, vector<1x128xf32>
    %4 = math.roundeven %3 : vector<1x128xf32>
    %cst = arith.constant 0.000000e+00 : f32
    %cst_2 = arith.constant 5.000000e+00 : f32
    %5 = vector.broadcast %cst : f32 to vector<1x128xf32>
    %6 = arith.maximumf %5, %4 : vector<1x128xf32>
    %7 = vector.broadcast %cst_2 : f32 to vector<1x128xf32>
    %8 = arith.minimumf %7, %6 : vector<1x128xf32>
    %c0_3 = arith.constant 0 : index
    %c0_4 = arith.constant 0 : index
    %9 = vector.load %arg2[%c0_3, %c0_4] : memref<1x128xf32, #tpu.memory_space<vmem>>, vector<1x128xf32>
    %10 = math.roundeven %9 : vector<1x128xf32>
    %cst_5 = arith.constant 0.000000e+00 : f32
    %cst_6 = arith.constant 5.000000e+00 : f32
    %11 = vector.broadcast %cst_5 : f32 to vector<1x128xf32>
    %12 = arith.maximumf %11, %10 : vector<1x128xf32>
    %13 = vector.broadcast %cst_6 : f32 to vector<1x128xf32>
    %14 = arith.minimumf %13, %12 : vector<1x128xf32>
    %15 = arith.subf %8, %14 : vector<1x128xf32>
    %c0_7 = arith.constant 0 : index
    %c0_8 = arith.constant 0 : index
    %16 = vector.load %arg4[%c0_7, %c0_8] : memref<1x1xf32, #tpu.memory_space<vmem>>, vector<1x1xf32>
    %17 = arith.mulf %15, %15 : vector<1x128xf32>
    %18 = vector.shape_cast %17 : vector<1x128xf32> to vector<1x1x128xf32>
    %cst_9 = arith.constant dense<0.000000e+00> : vector<1xf32>
    %19 = vector.multi_reduction <add>, %18, %cst_9 [1, 2] : vector<1x1x128xf32> to vector<1xf32>
    %20 = vector.shape_cast %19 : vector<1xf32> to vector<1x1x1xf32>
    %21 = vector.extract %20[0, 0, 0] : f32 from vector<1x1x1xf32>
    %22 = vector.broadcast %21 : f32 to vector<1x1xf32>
    %23 = arith.addf %16, %22 : vector<1x1xf32>
    %c0_10 = arith.constant 0 : index
    %c0_11 = arith.constant 0 : index
    %24 = vector.load %arg4[%c0_10, %c0_11] : memref<1x1xf32, #tpu.memory_space<vmem>>, vector<1x1xf32>
    tpu.vector_store %arg4[%c0_10, %c0_11], %23 {strides = array<i32>} : memref<1x1xf32, #tpu.memory_space<vmem>>, vector<1x1xf32>,
    %c0_12 = arith.constant 0 : index
    %c0_13 = arith.constant 0 : index
    %25 = vector.load %arg5[%c0_12, %c0_13] : memref<1x1xf32, #tpu.memory_space<vmem>>, vector<1x1xf32>
    %26 = vector.shape_cast %8 : vector<1x128xf32> to vector<1x1x128xf32>
    %cst_14 = arith.constant dense<0.000000e+00> : vector<1xf32>
    %27 = vector.multi_reduction <add>, %26, %cst_14 [1, 2] : vector<1x1x128xf32> to vector<1xf32>
    %28 = vector.shape_cast %27 : vector<1xf32> to vector<1x1x1xf32>
    %29 = vector.extract %28[0, 0, 0] : f32 from vector<1x1x1xf32>
    %30 = vector.broadcast %29 : f32 to vector<1x1xf32>
    %31 = arith.addf %25, %30 : vector<1x1xf32>
    %c0_15 = arith.constant 0 : index
    %c0_16 = arith.constant 0 : index
    %32 = vector.load %arg5[%c0_15, %c0_16] : memref<1x1xf32, #tpu.memory_space<vmem>>, vector<1x1xf32>
    tpu.vector_store %arg5[%c0_15, %c0_16], %31 {strides = array<i32>} : memref<1x1xf32, #tpu.memory_space<vmem>>, vector<1x1xf32>,
    %c0_17 = arith.constant 0 : index
    %c0_18 = arith.constant 0 : index
    %33 = vector.load %arg6[%c0_17, %c0_18] : memref<1x1xf32, #tpu.memory_space<vmem>>, vector<1x1xf32>
    %34 = vector.shape_cast %14 : vector<1x128xf32> to vector<1x1x128xf32>
    %cst_19 = arith.constant dense<0.000000e+00> : vector<1xf32>
    %35 = vector.multi_reduction <add>, %34, %cst_19 [1, 2] : vector<1x1x128xf32> to vector<1xf32>
    %36 = vector.shape_cast %35 : vector<1xf32> to vector<1x1x1xf32>
    %37 = vector.extract %36[0, 0, 0] : f32 from vector<1x1x1xf32>
    %38 = vector.broadcast %37 : f32 to vector<1x1xf32>
    %39 = arith.addf %33, %38 : vector<1x1xf32>
    %c0_20 = arith.constant 0 : index
    %c0_21 = arith.constant 0 : index
    %40 = vector.load %arg6[%c0_20, %c0_21] : memref<1x1xf32, #tpu.memory_space<vmem>>, vector<1x1xf32>
    tpu.vector_store %arg6[%c0_20, %c0_21], %39 {strides = array<i32>} : memref<1x1xf32, #tpu.memory_space<vmem>>, vector<1x1xf32>,
    %c0_22 = arith.constant 0 : index
    %c0_23 = arith.constant 0 : index
    %41 = vector.load %arg7[%c0_22, %c0_23] : memref<1x1xf32, #tpu.memory_space<vmem>>, vector<1x1xf32>
    %42 = arith.mulf %8, %8 : vector<1x128xf32>
    %43 = vector.shape_cast %42 : vector<1x128xf32> to vector<1x1x128xf32>
    %cst_24 = arith.constant dense<0.000000e+00> : vector<1xf32>
    %44 = vector.multi_reduction <add>, %43, %cst_24 [1, 2] : vector<1x1x128xf32> to vector<1xf32>
    %45 = vector.shape_cast %44 : vector<1xf32> to vector<1x1x1xf32>
    %46 = vector.extract %45[0, 0, 0] : f32 from vector<1x1x1xf32>
    %47 = vector.broadcast %46 : f32 to vector<1x1xf32>
    %48 = arith.addf %41, %47 : vector<1x1xf32>
    %c0_25 = arith.constant 0 : index
    %c0_26 = arith.constant 0 : index
    %49 = vector.load %arg7[%c0_25, %c0_26] : memref<1x1xf32, #tpu.memory_space<vmem>>, vector<1x1xf32>
    tpu.vector_store %arg7[%c0_25, %c0_26], %48 {strides = array<i32>} : memref<1x1xf32, #tpu.memory_space<vmem>>, vector<1x1xf32>,
    %c0_27 = arith.constant 0 : index
    %c0_28 = arith.constant 0 : index
    %50 = vector.load %arg8[%c0_27, %c0_28] : memref<1x1xf32, #tpu.memory_space<vmem>>, vector<1x1xf32>
    %51 = arith.mulf %14, %14 : vector<1x128xf32>
    %52 = vector.shape_cast %51 : vector<1x128xf32> to vector<1x1x128xf32>
    %cst_29 = arith.constant dense<0.000000e+00> : vector<1xf32>
    %53 = vector.multi_reduction <add>, %52, %cst_29 [1, 2] : vector<1x1x128xf32> to vector<1xf32>
    %54 = vector.shape_cast %53 : vector<1xf32> to vector<1x1x1xf32>
    %55 = vector.extract %54[0, 0, 0] : f32 from vector<1x1x1xf32>
    %56 = vector.broadcast %55 : f32 to vector<1x1xf32>
    %57 = arith.addf %50, %56 : vector<1x1xf32>
    %c0_30 = arith.constant 0 : index
    %c0_31 = arith.constant 0 : index
    %58 = vector.load %arg8[%c0_30, %c0_31] : memref<1x1xf32, #tpu.memory_space<vmem>>, vector<1x1xf32>
    tpu.vector_store %arg8[%c0_30, %c0_31], %57 {strides = array<i32>} : memref<1x1xf32, #tpu.memory_space<vmem>>, vector<1x1xf32>,
    %c0_i32_32 = arith.constant 0 : i32
    %59 = arith.cmpi eq, %arg0, %c0_i32_32 : i32
    %60 = arith.extui %59 : i1 to i32
    %c0_i32_33 = arith.constant 0 : i32
    %61 = arith.cmpi ne, %60, %c0_i32_33 : i32
    scf.if %61 {
      %c0_34 = arith.constant 0 : index
      %c0_35 = arith.constant 0 : index
      %62 = vector.load %arg4[%c0_34, %c0_35] : memref<1x1xf32, #tpu.memory_space<vmem>>, vector<1x1xf32>
      %c0_36 = arith.constant 0 : index
      %c0_37 = arith.constant 0 : index
      %63 = vector.load %arg7[%c0_36, %c0_37] : memref<1x1xf32, #tpu.memory_space<vmem>>, vector<1x1xf32>
      %c0_38 = arith.constant 0 : index
      %c0_39 = arith.constant 0 : index
      %64 = vector.load %arg8[%c0_38, %c0_39] : memref<1x1xf32, #tpu.memory_space<vmem>>, vector<1x1xf32>
      %65 = arith.addf %63, %64 : vector<1x1xf32>
      %c0_40 = arith.constant 0 : index
      %c0_41 = arith.constant 0 : index
      %66 = vector.load %arg5[%c0_40, %c0_41] : memref<1x1xf32, #tpu.memory_space<vmem>>, vector<1x1xf32>
      %cst_42 = arith.constant 2.000000e+00 : f32
      %67 = vector.broadcast %cst_42 : f32 to vector<1x1xf32>
      %68 = arith.mulf %67, %66 : vector<1x1xf32>
      %c0_43 = arith.constant 0 : index
      %c0_44 = arith.constant 0 : index
      %69 = vector.load %arg6[%c0_43, %c0_44] : memref<1x1xf32, #tpu.memory_space<vmem>>, vector<1x1xf32>
      %70 = arith.mulf %68, %69 : vector<1x1xf32>
      %cst_45 = arith.constant 7.812500e-03 : f32
      %71 = vector.broadcast %cst_45 : f32 to vector<1x1xf32>
      %72 = arith.mulf %70, %71 : vector<1x1xf32>
      %73 = arith.subf %65, %72 : vector<1x1xf32>
      %cst_46 = arith.constant 1.000000e-10 : f32
      %74 = vector.broadcast %cst_46 : f32 to vector<1x1xf32>
      %75 = arith.addf %73, %74 : vector<1x1xf32>
      %76 = arith.divf %62, %75 : vector<1x1xf32>
      %cst_47 = arith.constant 1.000000e+00 : f32
      %77 = vector.broadcast %cst_47 : f32 to vector<1x1xf32>
      %78 = arith.subf %77, %76 : vector<1x1xf32>
      %c0_48 = arith.constant 0 : index
      %c0_49 = arith.constant 0 : index
      %79 = vector.load %arg3[%c0_48, %c0_49] : memref<1x1xf32, #tpu.memory_space<vmem>>, vector<1x1xf32>
      tpu.vector_store %arg3[%c0_48, %c0_49], %78 {strides = array<i32>} : memref<1x1xf32, #tpu.memory_space<vmem>>, vector<1x1xf32>,
    } else {
    }
    return
  }
  func.func @transform_0(%arg0: i32) -> (i32, i32) {
    %c0_i32 = arith.constant 0 : i32
    %c0_i32_0 = arith.constant 0 : i32
    return %arg0, %c0_i32 : i32, i32
  }
  func.func @transform_1(%arg0: i32) -> (i32, i32) {
    %c0_i32 = arith.constant 0 : i32
    %c0_i32_0 = arith.constant 0 : i32
    return %arg0, %c0_i32 : i32, i32
  }
  func.func @transform_2(%arg0: i32) -> (i32, i32) {
    %c0_i32 = arith.constant 0 : i32
    %c0_i32_0 = arith.constant 0 : i32
    %c0_i32_1 = arith.constant 0 : i32
    return %c0_i32, %c0_i32_0 : i32, i32
  }
}

</mosaic_0001>

<bundles_post_ra>
// kernel: tpu_custom_call.1
= control target key start
LH: loop header
LB: loop body
LE: loop exit
PB: predicated region body
PF: predicated region fallthrough
CT: control target
= control target key end

     0   :  { %7 = vsyncpa [#allocation8], 0  ;;  %s337_s0 = inlined_call_operand.hbm [shape: f32[1,128], index: 0, kind: input, shape index: {}]   ;;  %s338_s1 = inlined_call_operand.hbm [shape: f32[1,128], index: 1, kind: input, shape index: {}]   ;;  %s339_s2 = inlined_call_operand.hbm [shape: f32[1,1], index: 2, kind: output, shape index: {}]  }
   0x1   :  { %8 = vsyncpa [#allocation11], 0 }
   0x2   :  { %9 = vsyncpa [#allocation9], 0  ;;  %s15_s11 = sshll.u32 %s337_s0, 4  ;;  %s293_s12 = smov [#allocation7]   ;;  %s16_s11 = int_to_ptr.hbm [resolvable:$true] %s15_s11 }
   0x3   :  { %s17_s13 = sshll.u32 %s293_s12, 4  ;;  %s26_s16 = sshll.u32 %s338_s1, 4  ;;  %s18_s13 = int_to_ptr.vmem [resolvable:$true] %s17_s13  ;;  %s27_s16 = int_to_ptr.hbm [resolvable:$true] %s26_s16 }
   0x4   :  { %20 = dma.hbm_to_vmem [thread:$0]  %s16_s11, 16, %s18_s13, [#allocation8]  }
   0x5   :  { %s294_s17 = smov [#allocation10]  }
   0x6   :  { %s28_s18 = sshll.u32 %s294_s17, 4  ;;  %s29_s18 = int_to_ptr.vmem [resolvable:$true] %s28_s18 }
   0x7   :  { %31 = dma.hbm_to_vmem [thread:$0]  %s27_s16, 16, %s29_s18, [#allocation11]  }
   0x8   :  { %287 = dma.done.wait [#allocation8], 16  }
   0x9   :  { %288 = vsyncadd [#allocation8], 4294967280 }
   0xa   :  { %289 = dma.done.wait [#allocation11], 16  }
   0xb   :  { %290 = vsyncadd [#allocation11], 4294967280  ;;  %v54_v0 = vld [vmem:[#allocation10] sm:$0x1]  ;;  %v50_v1 = vld [vmem:[#allocation7] sm:$0x1] }
   0xc   :  { %v193_v2 = vcvt.f32.s32 %v54_v0  ;;  %v191_v3 = vand.u32 2147483647, %v54_v0  ;;  %v185_v4 = vcvt.f32.s32 %v50_v1  ;;  %v196_v6 = vand.u32 2147483648, %v54_v0  ;;  %s296_s22 = smov [#allocation12]   ;;  %s172_s26 = sshll.u32 %s339_s2, 4  ;;  %s173_s26 = int_to_ptr.hbm [resolvable:$true] %s172_s26 }
   0xd   :  { %v183_v7 = vand.u32 2147483647, %v50_v1  ;;  %v188_v9 = vand.u32 2147483648, %v50_v1  ;;  %vm61_vm2 = vcmask 1040384   ;;  %vm44_vm3 = vcmask 0   ;;  %s170_s23 = sshll.u32 %s296_s22, 4  ;;  %s171_s23 = int_to_ptr.vmem [resolvable:$true] %s170_s23 }
   0xe   :  { %v194_v5 = vcvt.s32.f32 %v193_v2  ;;  %v186_v8 = vcvt.s32.f32 %v185_v4  ;;  %vm192_vm0 = vcmp.lt.f32.partialorder %v191_v3, 8388608.0  ;;  %v295_v29 = vmov 0.0  }
   0xf   :  { %vm184_vm1 = vcmp.lt.f32.partialorder %v183_v7, 8388608.0  ;;  %45 = vst.msk [vmem:[#allocation2] sm:$0x1] %vm44_vm3, %v295_v29 }
  0x10   :  { %v195_v10 = vand.u32 2147483647, %v194_v5  ;;  %v187_v11 = vand.u32 2147483647, %v186_v8  ;;  %46 = vst.msk [vmem:[#allocation3] sm:$0x1] %vm44_vm3, %v295_v29 }
  0x11   :  { %47 = vst.msk [vmem:[#allocation4] sm:$0x1] %vm44_vm3, %v295_v29 }
  0x12   :  { %v197_v12 = vor.u32 %v196_v6, %v195_v10  ;;  %v189_v13 = vor.u32 %v188_v9, %v187_v11  ;;  %48 = vst.msk [vmem:[#allocation5] sm:$0x1] %vm44_vm3, %v295_v29 }
  0x13   :  { %49 = vst.msk [vmem:[#allocation6] sm:$0x1] %vm44_vm3, %v295_v29 }
  0x14   :  { %v198_v14 = vsel %vm192_vm0, %v197_v12, %v54_v0  ;;  %v190_v16 = vsel %vm184_vm1, %v189_v13, %v50_v1 }
  0x15   :  { %v56_v15 = vmax.f32 %v198_v14, 0.0  ;;  %v52_v17 = vmax.f32 %v190_v16, 0.0 }
  0x16   :  { %v59_v1 = vld [vmem:[#allocation2] sm:$0x1] }
  0x17   :  { %v57_v18 = vmin.f32 %v56_v15, 5.0  ;;  %v53_v19 = vmin.f32 %v52_v17, 5.0  ;;  %v76_v4 = vld [vmem:[#allocation3] sm:$0x1] }
  0x18   :  { %v90_v5 = vld [vmem:[#allocation4] sm:$0x1] }
  0x19   :  { %v91_v20 = vsel %vm61_vm2, %v57_v18, 0.0  ;;  %v120_v21 = vmul.f32 %v57_v18, %v57_v18  ;;  %v58_v22 = vsub.f32 %v53_v19, %v57_v18  ;;  %v105_v24 = vmul.f32 %v53_v19, %v53_v19  ;;  %v104_v7 = vld [vmem:[#allocation5] sm:$0x1] }
  0x1a   :  { %92 = vadd.xlane.f32.xlu1 %v91_v20  ;;  %v77_v28 = vsel %vm61_vm2, %v53_v19, 0.0  ;;  %v119_v10 = vld [vmem:[#allocation6] sm:$0x1] }
  0x1b   :  { %v121_v23 = vsel %vm61_vm2, %v120_v21, 0.0  ;;  %v60_v25 = vmul.f32 %v58_v22, %v58_v22  ;;  %v106_v27 = vsel %vm61_vm2, %v105_v24, 0.0 }
  0x1c   :  { %122 = vadd.xlane.f32.xlu2 %v121_v23 }
  0x1d   :  { %v62_v26 = vsel %vm61_vm2, %v60_v25, 0.0 }
  0x1e   :  { %63 = vadd.xlane.f32.xlu0 %v62_v26 }
  0x22   :  { %107 = vadd.xlane.f32.xlu1 %v106_v27 }
  0x26   :  { %78 = vadd.xlane.f32.xlu0 %v77_v28 }
  0x8d   :  { %v93_v30 = vpop.xlane.xlu1 %92 }
  0x8e   :  { %v94_v32 = vrot.slane %v93_v30, 4 }
  0x8f   :  { %v123_v31 = vpop.xlane.xlu2 %122 }
  0x90   :  { %v124_v35 = vrot.slane %v123_v31, 4  ;;  %v95_v38 = vadd.f32 %v94_v32, %v93_v30 }
  0x91   :  { %v64_v33 = vpop.xlane.xlu0 %63 }
  0x92   :  { %v65_v34 = vrot.slane %v64_v33, 4  ;;  %v125_v41 = vadd.f32 %v124_v35, %v123_v31  ;;  %v96_v44 = vrot.slane %v95_v38, 2 }
  0x94   :  { %v66_v36 = vadd.f32 %v65_v34, %v64_v33  ;;  %v126_v49 = vrot.slane %v125_v41, 2  ;;  %v97_v52 = vadd.f32 %v96_v44, %v95_v38 }
  0x95   :  { %v108_v37 = vpop.xlane.xlu1 %107 }
  0x96   :  { %v109_v39 = vrot.slane %v108_v37, 4  ;;  %v67_v40 = vrot.slane %v66_v36, 2  ;;  %v127_v55 = vadd.f32 %v126_v49, %v125_v41  ;;  %v98_v57 = vrot.slane %v97_v52, 1 }
  0x98   :  { %v110_v42 = vadd.f32 %v109_v39, %v108_v37  ;;  %v68_v43 = vadd.f32 %v67_v40, %v66_v36  ;;  %v128_v60 = vrot.slane %v127_v55, 1  ;;  %v99_v62 = vadd.f32 %v98_v57, %v97_v52 }
  0x99   :  { %v79_v45 = vpop.xlane.xlu0 %78 }
  0x9a   :  { %v111_v46 = vrot.slane %v110_v42, 2  ;;  %v80_v47 = vrot.slane %v79_v45, 4  ;;  %v69_v48 = vrot.slane %v68_v43, 1  ;;  %v129_v0 = vadd.f32 %v128_v60, %v127_v55 }
  0x9c   :  { %v81_v50 = vadd.f32 %v80_v47, %v79_v45  ;;  %v70_v51 = vadd.f32 %v69_v48, %v68_v43  ;;  %v112_v53 = vadd.f32 %v111_v46, %v110_v42 }
  0x9e   :  { %v82_v54 = vrot.slane %v81_v50, 2  ;;  %199 = vpush %v70_v51  ;;  %v113_v59 = vrot.slane %v112_v53, 1 }
  0xa0   :  { %v83_v56 = vadd.f32 %v82_v54, %v81_v50  ;;  %v114_v63 = vadd.f32 %v113_v59, %v112_v53 }
  0xa2   :  { %v84_v58 = vrot.slane %v83_v56, 1 }
  0xa4   :  { %v85_v61 = vadd.f32 %v84_v58, %v83_v56 }
  0xa6   :  { %201 = vpush %v85_v61 }
  0xa7   :  { %203 = vpush %v99_v62 }
  0xa8   :  { %205 = vpush %v114_v63 }
  0xa9   :  { %207 = vpush %v129_v0 }
  0xcf   :  { %s200_s0 = spop %199 }
  0xd0   :  { %v72_v2 = vstv %s200_s0 }
  0xd1   :  { %v73_v3 = vadd.f32 %v72_v2, %v59_v1 }
  0xd3   :  { %75 = vst.msk [vmem:[#allocation2] sm:$0x1] %vm44_vm3, %v73_v3 }
  0xd7   :  { %s202_s1 = spop %201 }
  0xd8   :  { %v87_v6 = vstv %s202_s1  ;;  %s204_s19 = spop %203 }
  0xd9   :  { %v88_v8 = vadd.f32 %v87_v6, %v76_v4  ;;  %v101_v9 = vstv %s204_s19  ;;  %s206_s20 = spop %205 }
  0xda   :  { %v102_v11 = vadd.f32 %v101_v9, %v90_v5  ;;  %v116_v12 = vstv %s206_s20  ;;  %s208_s21 = spop %207  ;;  %v137_v35 = vld [vmem:[#allocation2] sm:$0x1] }
  0xdb   :  { %89 = vst.msk [vmem:[#allocation3] sm:$0x1] %vm44_vm3, %v88_v8  ;;  %v117_v13 = vadd.f32 %v116_v12, %v104_v7  ;;  %v131_v14 = vstv %s208_s21 }
  0xdc   :  { %103 = vst.msk [vmem:[#allocation4] sm:$0x1] %vm44_vm3, %v102_v11  ;;  %v132_v15 = vadd.f32 %v131_v14, %v119_v10 }
  0xdd   :  { %118 = vst.msk [vmem:[#allocation5] sm:$0x1] %vm44_vm3, %v117_v13 }
  0xde   :  { %133 = vst.msk [vmem:[#allocation6] sm:$0x1] %vm44_vm3, %v132_v15 }
  0xe2   :  { %v141_v16 = vld [vmem:[#allocation3] sm:$0x1] }
  0xe3   :  { %v142_v17 = vmul.f32 2.0, %v141_v16  ;;  %v143_v19 = vld [vmem:[#allocation4] sm:$0x1] }
  0xe4   :  { %v138_v18 = vld [vmem:[#allocation5] sm:$0x1] }
  0xe5   :  { %v139_v20 = vld [vmem:[#allocation6] sm:$0x1]  ;;  %v144_v21 = vmul.f32 %v143_v19, %v142_v17 }
  0xe6   :  { %v140_v22 = vadd.f32 %v139_v20, %v138_v18 }
  0xe7   :  { %v145_v23 = vmul.f32 0.0078125, %v144_v21 }
  0xe9   :  { %v146_v24 = vsub.f32 %v140_v22, %v145_v23 }
  0xeb   :  { %v147_v25 = vadd.f32 1e-10, %v146_v24 }
  0xed   :  { %213 = vrcp.f32 %v147_v25  ;;  %v159_v29 = vand.u32 2147483648, %v147_v25  ;;  %v157_v31 = vand.u32 2147483647, %v147_v25  ;;  %vm153_vm5 = vweird.f32 %v147_v25 }
  0xef   :  { %v160_v33 = vor.u32 1.1754944e-38, %v159_v29  ;;  %vm158_vm7 = vcmp.eq.f32.partialorder %v157_v31, 8.507059e+37 }
  0xf3   :  { %v214_v26 = vpop.eup %213 }
  0xf4   :  { %v149_v27 = vmul.f32 %v214_v26, %v147_v25  ;;  %vm154_vm4 = vweird.f32 %v214_v26 }
  0xf5   :  { %vm155_vm6 = vmor %vm153_vm5, %vm154_vm4 }
  0xf6   :  { %v150_v28 = vsub.f32 1.0, %v149_v27 }
  0xf8   :  { %v151_v30 = vmul.f32 %v214_v26, %v150_v28 }
  0xfa   :  { %v152_v32 = vadd.f32 %v214_v26, %v151_v30 }
  0xfc   :  { %v156_v34 = vsel %vm155_vm6, %v214_v26, %v152_v32 }
  0xfd   :  { %v161_v36 = vsel %vm158_vm7, %v160_v33, %v156_v34 }
  0xfe   :  { %v162_v37 = vmul.f32 %v161_v36, %v137_v35 }
 0x100   :  { %v163_v38 = vsub.f32 1.0, %v162_v37 }
 0x102   :  { %164 = vst.msk [vmem:[#allocation12] sm:$0x1] %vm44_vm3, %v163_v38 }
 0x103   :  { %175 = dma.vmem_to_hbm [thread:$0]  %s171_s23, 16, %s173_s26, [#allocation9]  }
 0x104   :  { %291 = dma.done.wait [#allocation9], 16  }
 0x105   :  { %292 = vsyncadd [#allocation9], 4294967280 }
 0x106   :  { %180 = vsyncpa [#allocation8], 1 }
 0x107   :  { %181 = vsyncpa [#allocation11], 1 }
 0x108   :  { %182 = vsyncpa [#allocation9], 1 }

</bundles_post_ra>
